<compile_context>
chip_gen: v5e
topology: v5e:2x2
jax: 0.10.0
libtpu: 0.0.40
codegen_flags: <defaults>
</compile_context>

<pallas_src>
import functools

import jax
import jax.numpy as jnp
from jax.experimental import pallas as pl
from jax.experimental.pallas import tpu as pltpu


def _noise_kernel(x_ref, n_ref, w_ref, o_ref, *, tc, single_c_tile):
    # x_ref: (1, tc, thw)    current channel/spatial tile of the input
    # n_ref: (1, 1, thw)     noise-plane tile (reused across channel tiles)
    # w_ref: (1, C_pad, 1)   full per-channel scale (fetched once, constant index)
    if single_c_tile:
        w = w_ref[...]                                  # (1, tc, 1)
    else:
        # tc is a multiple of 8 here by construction, so the sublane slice is aligned.
        c = pl.program_id(2)
        start = pl.multiple_of(c * tc, 8)
        w = w_ref[:, pl.ds(start, tc), :]               # (1, tc, 1)
    # Pure VPU FMA: noise broadcasts across channels (sublanes), weight broadcasts
    # across the spatial lane axis. No XLU relayout required.
    o_ref[...] = x_ref[...] + n_ref[...] * w


def _tpu_budget():
    """(target x-block bytes, vmem_limit_bytes) per TPU generation."""
    try:
        cap = pltpu.get_tpu_info().vmem_capacity_bytes
    except Exception:
        cap = 64 * 1024 * 1024                          # conservative (v7x-class)
    if cap <= 64 * 1024 * 1024:                         # v7x: 64 MiB VMEM per TC
        return 6 * 1024 * 1024, 48 * 1024 * 1024
    return 8 * 1024 * 1024, 64 * 1024 * 1024            # v5e / v6e: 128 MiB VMEM


def _choose_tiles(C, HW, itemsize, target_bytes):
    """Pick (tc, thw) so each x block is ~target_bytes, independent of the shape."""
    sub = max(8, 32 // itemsize)        # sublane packing: 8 f32, 16 bf16, 32 int8/fp8
    row_bytes = HW * itemsize
    # Tile the lane (HW) axis only when even a minimal channel tile would blow the
    # target; thw must be a multiple of 128 unless it equals the full HW extent.
    if HW <= 128 or row_bytes * min(C, sub) <= target_bytes:
        thw = HW
    else:
        thw = (target_bytes // (sub * itemsize)) // 128 * 128
        thw = int(max(128, min(thw, HW)))
    # Channel tile fills the remaining budget, aligned to the sublane packing.
    tc = target_bytes // max(1, thw * itemsize)
    if tc >= C:
        tc = C
    else:
        tc = int(min(max(sub, (tc // sub) * sub), C))
    return tc, thw


def intermediate_noise(x, weight, noise=None, *, training=True, key=None,
                       target_block_bytes=None):
    """JAX/Pallas equivalent of IntermediateNoise.forward.

    x:      (B, C, H, W)
    weight: (1, C, 1, 1) per-channel noise scale
    noise:  optional (B, 1, H, W); if None (training), a fresh draw requires `key`.
    """
    if not training:
        return x

    B, C, H, W = x.shape
    HW = H * W

    if noise is None:
        if key is None:
            raise ValueError(
                "intermediate_noise: pass `noise` or a PRNG `key` for a fresh draw")
        # TODO(synk): generate fresh noise in-kernel (pltpu.prng_random_bits +
        # Box-Muller) to skip the extra HBM round-trip of the (B,1,H,W) plane.
        noise = jax.random.normal(key, (B, 1, H, W), dtype=x.dtype)

    itemsize = jnp.dtype(x.dtype).itemsize
    target_bytes, vmem_limit = _tpu_budget()
    if target_block_bytes is not None:
        target_bytes = int(target_block_bytes)
    tc, thw = _choose_tiles(C, HW, itemsize, target_bytes)

    n_c = pl.cdiv(C, tc)
    n_hw = pl.cdiv(HW, thw)
    grid = (B, n_hw, n_c)                     # C innermost -> noise block reused

    # Lane-dense layout: spatial dims flattened onto the lane axis.
    x2 = x.reshape(B, C, HW)
    n2 = jnp.asarray(noise, dtype=x.dtype).reshape(B, 1, HW)
    # Whole weight fetched once; pad channels so the in-kernel pl.ds slice of the
    # last (partial) channel tile stays in bounds.
    c_pad = n_c * tc
    w2 = jnp.reshape(weight, (1, C, 1)).astype(x.dtype)
    if c_pad != C:
        w2 = jnp.pad(w2, ((0, 0), (0, c_pad - C), (0, 0)))

    out2 = pl.pallas_call(
        functools.partial(_noise_kernel, tc=tc, single_c_tile=(n_c == 1)),
        out_shape=jax.ShapeDtypeStruct((B, C, HW), x.dtype),
        grid=grid,
        in_specs=[
            pl.BlockSpec((1, tc, thw), lambda b, hw, c: (b, c, hw)),    # x
            pl.BlockSpec((1, 1, thw), lambda b, hw, c: (b, 0, hw)),     # noise
            pl.BlockSpec((1, c_pad, 1), lambda b, hw, c: (0, 0, 0)),    # weight
        ],
        out_specs=pl.BlockSpec((1, tc, thw), lambda b, hw, c: (b, c, hw)),
        compiler_params=pltpu.CompilerParams(
            dimension_semantics=("parallel", "parallel", "parallel"),
            vmem_limit_bytes=int(vmem_limit),
        ),
    )(x2, n2, w2)

    return out2.reshape(B, C, H, W)


if __name__ == "__main__":
    key = jax.random.PRNGKey(0)
    k_x, k_w, k_n, k_fresh, k_x2, k_w2, k_n2 = jax.random.split(key, 7)

    # Small default-path shapes (single channel tile, full-HW blocks).
    B, C, H, W = 2, 4, 16, 16
    x = jax.random.normal(k_x, (B, C, H, W), dtype=jnp.float32)
    weight = jax.random.normal(k_w, (1, C, 1, 1), dtype=jnp.float32)
    noise = jax.random.normal(k_n, (B, 1, H, W), dtype=jnp.float32)

    out = jax.block_until_ready(
        intermediate_noise(x, weight, noise=noise, training=True))
    ref = x + noise * weight
    assert out.shape == (B, C, H, W)
    assert jnp.allclose(out, ref, atol=1e-6, rtol=1e-6), "mismatch vs reference"

    # Training path with a fresh (keyed) noise draw (generated in the wrapper,
    # bit-identical to jax.random.normal).
    out_fresh = jax.block_until_ready(
        intermediate_noise(x, weight, training=True, key=k_fresh))
    ref_fresh = x + jax.random.normal(k_fresh, (B, 1, H, W), dtype=x.dtype) * weight
    assert jnp.allclose(out_fresh, ref_fresh, atol=1e-6, rtol=1e-6)

    # Eval mode is identity.
    assert jnp.array_equal(intermediate_noise(x, weight, training=False), x)

    # Exercise the tiled-HW / tiled-C path with a tiny block target:
    # f32, HW=4096, target 64 KiB -> thw=2048, tc=8, grid=(2, 2, 3),
    # including a partial last channel tile (C=20) and padded weight.
    B2, C2, H2, W2 = 2, 20, 64, 64
    x_b = jax.random.normal(k_x2, (B2, C2, H2, W2), dtype=jnp.float32)
    w_b = jax.random.normal(k_w2, (1, C2, 1, 1), dtype=jnp.float32)
    n_b = jax.random.normal(k_n2, (B2, 1, H2, W2), dtype=jnp.float32)
    out_b = jax.block_until_ready(
        intermediate_noise(x_b, w_b, noise=n_b, training=True,
                           target_block_bytes=64 * 1024))
    ref_b = x_b + n_b * w_b
    assert jnp.allclose(out_b, ref_b, atol=1e-6, rtol=1e-6), "tiled-path mismatch"

    print("KERNEL_OK")
</pallas_src>

<mosaic_0001>
module attributes {stable_mosaic.version = 11 : i64} {
  func.func @_noise_kernel(%arg0: i32, %arg1: i32, %arg2: i32, %arg3: memref<1x4x256xf32, #tpu.memory_space<vmem>>, %arg4: memref<1x1x256xf32, #tpu.memory_space<vmem>>, %arg5: memref<1x4x1xf32, #tpu.memory_space<vmem>>, %arg6: memref<1x4x256xf32, #tpu.memory_space<vmem>>) attributes {dimension_semantics = [#tpu.dimension_semantics<parallel>, #tpu.dimension_semantics<parallel>, #tpu.dimension_semantics<parallel>], iteration_bounds = array<i64: 2, 1, 1>, scalar_prefetch = 0 : i64, scratch_operands = 0 : i64, tpu.core_type = #tpu.core_type<tc>, window_params = [{transform_indices = @transform_0, window_bounds = array<i64: 1, 4, 256>}, {transform_indices = @transform_1, window_bounds = array<i64: 1, 1, 256>}, {pipeline_mode = #tpu.pipeline_mode<synchronous>, transform_indices = @transform_2, window_bounds = array<i64: 1, 4, 1>}, {transform_indices = @transform_3, window_bounds = array<i64: 1, 4, 256>}]} {
    %c0 = arith.constant 0 : index
    %c0_0 = arith.constant 0 : index
    %c0_1 = arith.constant 0 : index
    %0 = vector.load %arg5[%c0, %c0_0, %c0_1] : memref<1x4x1xf32, #tpu.memory_space<vmem>>, vector<1x4x1xf32>
    %c0_2 = arith.constant 0 : index
    %c0_3 = arith.constant 0 : index
    %c0_4 = arith.constant 0 : index
    %1 = vector.load %arg3[%c0_2, %c0_3, %c0_4] : memref<1x4x256xf32, #tpu.memory_space<vmem>>, vector<1x4x256xf32>
    %c0_5 = arith.constant 0 : index
    %c0_6 = arith.constant 0 : index
    %c0_7 = arith.constant 0 : index
    %2 = vector.load %arg4[%c0_5, %c0_6, %c0_7] : memref<1x1x256xf32, #tpu.memory_space<vmem>>, vector<1x1x256xf32>
    %3 = vector.broadcast %2 : vector<1x1x256xf32> to vector<1x4x256xf32>
    %4 = vector.broadcast %0 : vector<1x4x1xf32> to vector<1x4x256xf32>
    %5 = arith.mulf %3, %4 : vector<1x4x256xf32>
    %6 = arith.addf %1, %5 : vector<1x4x256xf32>
    %c0_8 = arith.constant 0 : index
    %c0_9 = arith.constant 0 : index
    %c0_10 = arith.constant 0 : index
    %7 = vector.load %arg6[%c0_8, %c0_9, %c0_10] : memref<1x4x256xf32, #tpu.memory_space<vmem>>, vector<1x4x256xf32>
    tpu.vector_store %arg6[%c0_8, %c0_9, %c0_10], %6 {strides = array<i32>} : memref<1x4x256xf32, #tpu.memory_space<vmem>>, vector<1x4x256xf32>,
    return
  }
  func.func @transform_0(%arg0: i32, %arg1: i32, %arg2: i32) -> (i32, i32, i32) {
    %c0_i32 = arith.constant 0 : i32
    return %arg0, %arg2, %arg1 : i32, i32, i32
  }
  func.func @transform_1(%arg0: i32, %arg1: i32, %arg2: i32) -> (i32, i32, i32) {
    %c0_i32 = arith.constant 0 : i32
    %c0_i32_0 = arith.constant 0 : i32
    return %arg0, %c0_i32, %arg1 : i32, i32, i32
  }
  func.func @transform_2(%arg0: i32, %arg1: i32, %arg2: i32) -> (i32, i32, i32) {
    %c0_i32 = arith.constant 0 : i32
    %c0_i32_0 = arith.constant 0 : i32
    %c0_i32_1 = arith.constant 0 : i32
    %c0_i32_2 = arith.constant 0 : i32
    return %c0_i32, %c0_i32_0, %c0_i32_1 : i32, i32, i32
  }
  func.func @transform_3(%arg0: i32, %arg1: i32, %arg2: i32) -> (i32, i32, i32) {
    %c0_i32 = arith.constant 0 : i32
    return %arg0, %arg2, %arg1 : i32, i32, i32
  }
}

</mosaic_0001>

<bundles_post_ra>
// kernel: tpu_custom_call.1
= control target key start
LH: loop header
LB: loop body
LE: loop exit
PB: predicated region body
PF: predicated region fallthrough
CT: control target
= control target key end

     0   :  { %8 = vsyncpa [#allocation3], 0  ;;  %s750_s0 = inlined_call_operand.hbm [shape: f32[2,4,256], index: 0, kind: input, shape index: {}]   ;;  %s751_s1 = inlined_call_operand.vmem [shape: f32[2,1,256], index: 1, kind: input, shape index: {}]   ;;  %s752_s2 = inlined_call_operand.vmem [shape: f32[1,4,1], index: 2, kind: input, shape index: {}]   ;;  %s753_s3 = inlined_call_operand.hbm [shape: f32[2,4,256], index: 3, kind: output, shape index: {}]  }
   0x1   :  { %10 = vsyncpa [#allocation3 + $0x1], 0 }
   0x2   :  { %11 = vsyncpa [#allocation4], 0 }
   0x3   :  { %13 = vsyncpa [#allocation4 + $0x1], 0  ;;  %s622_s12 = smov 0   ;;  %s624_s13 = smov 0  }
   0x4   :  { %s626_s14 = smov 0   ;;  %s628_s15 = smov 0  }
   0x5   :  { %s630_s16 = smov 0   ;;  %s632_s17 = smov 0  }
   0x6 LB: > { %s405_s18 = sadd.s32 4294967295, %s599_s17   ;;  %s406_s19 = sadd.s32 4294967294, %s599_s17   ;;  %s599_s17 = sphi %s632_s17, %s19_s17   ;;  %s595_s16 = sphi %s630_s16, %s762_s16   ;;  %s591_s15 = sphi %s628_s15, %s761_s15   ;;  %s587_s14 = sphi %s626_s14, %s760_s14   ;;  %s583_s13 = sphi %s624_s13, %s759_s13   ;;  %s579_s12 = sphi %s622_s12, %s758_s12  }
   0x7   : > { %s38_s20 = sadd.s32 1, %s595_s16  ;;  %s49_s21 = sadd.s32 1, %s587_s14 }
   0x8   : > { %p40_p0 = scmp.ge.s32.totalorder %s38_s20, 2  ;;  %p56_p1 = scmp.ne.s32.totalorder %s587_s14, %s583_s13 }
   0x9   : > { %p57_p2 = scmp.eq.s32.totalorder %s599_s17, 0  ;;  %p62_p3 = scmp.ne.s32.totalorder %s583_s13, %s579_s12 }
   0xa   : > { %s764_s20 = smov (%p40_p0, %s38_s20), 0  ;;  %p63_p5 = scmp.eq.s32.totalorder %s405_s18, 0 }
   0xb   : > { %p663_p4 = por %p57_p2, %p56_p1  ;;  %s42_s23 = ssub.s32 %s595_s16, %s764_s20 }
   0xc   : > { %p139_p6 = scmp.eq.s32.totalorder %s405_s18, 1  ;;  %p47_p7 = scmp.eq.s32.totalorder %s42_s23, 0 }
   0xd   : > { %p669_p8 = por %p63_p5, %p62_p3  ;;  %p145_p10 = scmp.eq.s32.totalorder %s406_s19, 1 }
   0xe   : > { %p673_p9 = por %p139_p6, %p56_p1  ;;  %p408_p12 = scmp.ge.s32.totalorder %s599_s17, 2 }
   0xf   : > { %s678_s26 = scalar_select %p47_p7, %s587_s14, %s49_s21  }
  0x10   : > { %p680_p11 = por %p145_p10, %p62_p3  ;;  %p435_p13 = scmp.lt.s32.totalorder %s599_s17, 2 }
  0x11   : > { %s168_s28 = sand.u32 1, %s587_s14   ;;  %s421_s30 = sshll.u32 %s595_s16, 3 }
  0x12   : > { %s409_s29 = sshll.u32 %s168_s28, 3  ;;  %s181_s6 = scalar_lea.hbm %s750_s0, %s421_s30 }
  0x13   : > { %s172_s7 = scalar_lea.vmem [#allocation2], %s409_s29  ;;  %s183_s9 = sshll.u32 %s181_s6, 4  ;;  %s184_s9 = int_to_ptr.hbm [resolvable:$true] %s183_s9 }
  0x14   : > { %s185_s8 = sshll.u32 %s172_s7, 4  ;;  %p428_p0 = pnand %p435_p13, %p663_p4  ;;  %s186_s8 = int_to_ptr.vmem [resolvable:$true] %s185_s8 }
  0x15   : > { %p412_p1 = scmp.ge.s32.totalorder %s599_s17, 1  ;;  %p202_p2 = scmp.lt.s32.totalorder %s599_s17, 3 }
  0x16   : > { %s169_s10 = scalar_lea.sflag [#allocation3], %s168_s28 }
  0x17   : > { %430 = dma.hbm_to_vmem [thread:$0]  (!%p428_p0), %s184_s9, 128, %s186_s8, %s169_s10  }
  0x18   : > { %p203_p3 = pnand %p412_p1, %p202_p2 }
  0x19   : > { %s696_s11 = sand.u32 (!%p203_p3), 1, %s583_s13  }
  0x1a   : > { %206 = sbr.rel (%p203_p3) target bundleno = 159 (0x9f), region = 32  ;;  %s413_s18 = sshll.u32 (!%p203_p3), %s696_s11, 3 }
  0x1b   : > { %s209_s19 = scalar_lea.sflag (!%p203_p3), [#allocation3], %s696_s11  ;;  %s212_s21 = scalar_lea.vmem (!%p203_p3), [#allocation2], %s413_s18 }
  0x1f   : > { %570 = dma.done.wait (%p669_p8), %s209_s19, 128  }
  0x20   : > { %572 = vsyncadd (%p669_p8), %s209_s19, 4294967168  ;;  %v601_v0 = vmov 0   ;;  %v255_v1 = vld [vmem:[%s752_s2] sm:$0xf]  ;;  %p246_p4 = scmp.lt.s32.totalorder %s591_s15, 1  ;;  %s422_s24 = sshll.u32 %s591_s15, 3 }
  0x21   : > { %486 = vset.pattern.permute.xlu0 %v601_v0  ;;  %s294_s8 = scalar_lea.hbm %s753_s3, %s422_s24  ;;  %vm273_vm0 = vcmask 1043456   ;;  %v256_v7 = vld [vmem:[%s212_s21] sm:$0xff]  ;;  %s243_s9 = scalar_lea.vmem [#allocation5], %s413_s18 }
  0x22   : > { %265 = vperm.xlu0 %486, %v255_v1   ;;  %s247_s28 = scalar_select %p246_p4, %s591_s15, 1 }
  0x23   : > { %s296_s10 = sshll.u32 %s243_s9, 4  ;;  %s298_s19 = sshll.u32 %s294_s8, 4  ;;  %s297_s10 = int_to_ptr.vmem [resolvable:$true] %s296_s10  ;;  %s299_s19 = int_to_ptr.hbm [resolvable:$true] %s298_s19 }
  0x24   : > { %s415_s29 = sshll.u32 %s247_s28, 1  ;;  %s279_s15 = scalar_lea.sflag [#allocation4], %s696_s11 }
  0x25   : > { %s252_s5 = scalar_lea.vmem %s751_s1, %s415_s29  ;;  %s531_s22 = sshra.s32 %s299_s19, 4  ;;  %s532_s22 = int_to_ptr.hbm [resolvable:$true] %s531_s22 }
  0x26   : > { %v257_v2 = vld [vmem:[%s252_s5] sm:$0x3]  ;;  %s533_s23 = scalar_lea.hbm %s532_s22, 8  ;;  %s537_s29 = scalar_lea.hbm %s753_s3, 16 }
  0x27   : > { %v260_v3 = vperm.slane %v257_v2, 1  ;;  %v259_v4 = vperm.slane %v257_v2, 0  ;;  %p534_p5 = scmp.ne.s32.totalorder %s532_s22, %s533_s23  ;;  %p538_p8 = scmp.lt.s32.totalorder %s532_s22, %s753_s3 }
  0x28   : > { %p539_p10 = scmp.lt.s32.totalorder %s537_s29, %s533_s23 }
  0x29   : > { %p535_p6 = pnand %p534_p5, %p673_p9 }
  0x2a   : > { %p540_p13 = por %p539_p10, %p538_p8 }
  0x2b   : > { %p536_p7 = pneg %p535_p6 }
  0x2d   : > { %p541_p0 = pnand %p540_p13, %p536_p7 }
  0x94   : > { %v266_v5 = vpop.permute.xlu0 %265 }
  0x95   : > { %v269_v6 = vmul.f32 %v266_v5, %v260_v3  ;;  %v268_v8 = vmul.f32 %v266_v5, %v259_v4 }
  0x97   : > { %v272_v9 = vrot.slane %v269_v6, 4 }
  0x99   : > { %v274_v10 = vsel %vm273_vm0, %v268_v8, %v272_v9 }
  0x9a   : > { %v276_v11 = vadd.f32 %v274_v10, %v256_v7 }
  0x9c   : > { %277 = vst [vmem:[%s243_s9] sm:$0xff] %v276_v11 }
  0x9d   : > { %544 = shalt.err (!%p541_p0)
}
  0x9e   : > { %425 = dma.vmem_to_hbm [thread:$0]  (%p673_p9), %s297_s10, 128, %s299_s19, %s279_s15  }
  0x9f PF: > { %s310_s11 = sand.u32 1, %s579_s12   ;;  %p432_p1 = pnand %p408_p12, %p680_p11 }
  0xa0   : > { %s311_s4 = scalar_lea.sflag [#allocation4], %s310_s11 }
  0xa1   : > { %p433_p2 = pneg %p432_p1 }
  0xa3   : > { %574 = dma.done.wait (%p433_p2), %s311_s4, 128  }
  0xa4   : > { %576 = vsyncadd (%p433_p2), %s311_s4, 4294967168  ;;  %s19_s17 = sadd.s32 1, %s599_s17   ;;  %s758_s12 = smov %s583_s13 }
  0xa5   : > { %p16_p3 = scmp.ge.s32.totalorder %s19_s17, 4   ;;  %s759_s13 = smov %s587_s14 }
  0xa6   : > { %s760_s14 = smov %s678_s26  ;;  %s761_s15 = smov %s595_s16 }
  0xa7   : > { %s762_s16 = smov %s764_s20  ;;  %18 = sbr.rel (!%p16_p3) target bundleno = 6 (0x6), region = 80 }
  0xac   :  { %317 = vsyncpa [#allocation3], 1 }
  0xad   :  { %319 = vsyncpa [#allocation3 + $0x1], 1 }
  0xae   :  { %320 = vsyncpa [#allocation4], 1 }
  0xaf   :  { %322 = vsyncpa [#allocation4 + $0x1], 1 }

</bundles_post_ra>
